<compile_context>
chip_gen: v7x
topology: tpu7x:2x2x1
jax: 0.10.0
libtpu: 0.0.40
codegen_flags: <defaults>
</compile_context>

<pallas_src>
import jax
import jax.numpy as jnp
from jax.experimental import pallas as pl
from jax.experimental.pallas import tpu as pltpu

_MIB = 1 << 20


def _round_up(x, m):
    return ((x + m - 1) // m) * m


def _vmem_capacity_bytes():
    try:
        return int(pltpu.get_tpu_info().vmem_capacity_bytes)
    except Exception:
        return 64 * _MIB  # conservative (v7x-sized) fallback


def _choose_tile_d(d, vmem_cap):
    """fc2 output-column tile: stream W2 columns when both full DxD weights
    would crowd VMEM. 64 MiB parts (v7x) stream earlier than 128 MiB parts."""
    thresh = 1024 if vmem_cap <= 64 * _MIB else 2048
    if d > thresh:
        for cand in (1024, 512, 256, 128):
            if d % cand == 0:
                return cand
    return d


def _choose_tile_n(n, *, two_tc, big_vmem, streaming_w2):
    """Batch-tile rows (multiple of 16 for bf16 sublane packing)."""
    n16 = _round_up(max(n, 1), 16)
    if n16 <= 128:
        return n16
    if n16 <= 256:
        # Single tile on 1-TC chips (v5e/v6e); two 128-row steps on v7x so the
        # "parallel" batch axis can shard across its two TensorCores.
        return 128 if two_tc else n16
    if n16 <= 512:
        return 256 if two_tc else n16
    # Large batches: when W2 is re-streamed once per batch tile, bigger batch
    # tiles raise arithmetic intensity; 128 MiB parts (v6e) afford 512 rows.
    if streaming_w2 and big_vmem:
        return 512
    return 256


def _choose_tile_k(d):
    for cand in (512, 256, 128):
        if cand < d and d % cand == 0:
            return cand
    return None


def _needs_w1_stream(d, vmem_cap):
    # Full bf16 W1 (single-buffered) is 2*d*d bytes; stream it through HBM
    # slabs when that alone would crowd the part's VMEM (review thresholds:
    # ~3072 on 64 MiB parts, ~6144 on 128 MiB parts).
    return d >= (3072 if vmem_cap <= 64 * _MIB else 6144)


def _fused_kernel(x_ref, w1_ref, b1_ref, w2_ref, b2_ref, out_ref, h_ref):
    # NOTE: the cached ReLU(fc1) scratch is only correct because the fc2
    # column axis j (program_id(1)) is the innermost, sequentially iterated
    # "arbitrary" grid axis: h is recomputed exactly when a new batch tile
    # (i) starts.
    @pl.when(pl.program_id(1) == 0)
    def _():
        h = jnp.dot(x_ref[...].astype(jnp.bfloat16), w1_ref[...],
                    preferred_element_type=jnp.float32)
        h_ref[...] = jnp.maximum(h + b1_ref[...], 0.0).astype(h_ref.dtype)

    y = jnp.dot(h_ref[...], w2_ref[...], preferred_element_type=jnp.float32)
    out_ref[...] = (y + b2_ref[...]).astype(out_ref.dtype)


def _make_w1_stream_kernel(tile_k, num_k):
    """fc1 computed by streaming W1 in (tile_k, D) bf16 slabs from HBM through
    a manually double-buffered VMEM scratch, accumulating in f32."""

    def kernel(x_ref, w1_hbm, b1_ref, w2_ref, b2_ref, out_ref,
               h_ref, acc_ref, w1_buf, dma_sem):
        @pl.when(pl.program_id(1) == 0)
        def _():
            def slab_copy(k, slot):
                return pltpu.make_async_copy(
                    w1_hbm.at[pl.ds(k * tile_k, tile_k), :],
                    w1_buf.at[slot], dma_sem.at[slot])

            slab_copy(0, 0).start()
            acc_ref[...] = jnp.zeros_like(acc_ref)
            for k in range(num_k):  # static, small trip-count -> unrolled
                slot = k % 2
                slab_copy(k, slot).wait()
                if k + 1 < num_k:
                    slab_copy(k + 1, 1 - slot).start()
                xs = x_ref[:, k * tile_k:(k + 1) * tile_k].astype(jnp.bfloat16)
                acc_ref[...] += jnp.dot(xs, w1_buf[slot],
                                        preferred_element_type=jnp.float32)
            h_ref[...] = jnp.maximum(acc_ref[...] + b1_ref[...], 0.0
                                     ).astype(h_ref.dtype)

        y = jnp.dot(h_ref[...], w2_ref[...], preferred_element_type=jnp.float32)
        out_ref[...] = (y + b2_ref[...]).astype(out_ref.dtype)

    return kernel


def prepare_params(w1, b1, w2, b2):
    """One-time cast of the Linear params for the kernel: bf16 weights laid
    out (in, out), f32 (1, D) biases.  Call once (at init / outside the hot
    loop); the per-call wrapper then performs no weight-conversion traffic."""
    def _bias(b):
        return jnp.asarray(b, jnp.float32).reshape(1, -1)
    return (jnp.asarray(w1, jnp.bfloat16), _bias(b1),
            jnp.asarray(w2, jnp.bfloat16), _bias(b2))


def vae_decoder(x, w1, b1, w2, b2, *, tile_n=None, tile_d=None, tile_k=None,
                out_dtype=jnp.float32):
    """Fused VAEDecoder forward: relu(x @ W1 + b1) @ W2 + b2.

    x: (N, D); w1/w2: (D, D) laid out (in, out) (i.e. transposed vs. torch's
    nn.Linear.weight); b1/b2: (1, D) or (D,).  Pass params through
    prepare_params once so these casts are no-ops.
    """
    n, d = x.shape
    if w1.dtype != jnp.bfloat16:
        w1 = w1.astype(jnp.bfloat16)
    if w2.dtype != jnp.bfloat16:
        w2 = w2.astype(jnp.bfloat16)
    b1 = jnp.asarray(b1, jnp.float32).reshape(1, -1)
    b2 = jnp.asarray(b2, jnp.float32).reshape(1, -1)
    assert w1.shape == (d, d) and w2.shape == (d, d)
    assert b1.shape == (1, d) and b2.shape == (1, d)

    vmem_cap = _vmem_capacity_bytes()
    two_tc = vmem_cap <= 64 * _MIB     # v7x proxy: 2 TensorCores, 64 MiB VMEM
    big_vmem = vmem_cap >= 96 * _MIB   # v5e / v6e: 128 MiB VMEM

    if tile_d is None:
        tile_d = _choose_tile_d(d, vmem_cap)
    assert d % tile_d == 0 and (tile_d % 128 == 0 or tile_d == d)

    stream_w1 = (tile_k is not None) or _needs_w1_stream(d, vmem_cap)
    if stream_w1 and tile_k is None:
        tile_k = _choose_tile_k(d)
        stream_w1 = tile_k is not None
    if stream_w1:
        assert d % tile_k == 0 and tile_k % 128 == 0 and tile_k < d

    if tile_n is None:
        tile_n = _choose_tile_n(n, two_tc=two_tc, big_vmem=big_vmem,
                                streaming_w2=tile_d < d)
    assert tile_n % 16 == 0

    n_pad = _round_up(n, tile_n)
    xp = jnp.pad(x, ((0, n_pad - n), (0, 0))) if n_pad != n else x

    num_i = n_pad // tile_n
    num_j = d // tile_d
    grid = (num_i, num_j)

    x_item = xp.dtype.itemsize
    out_item = jnp.dtype(out_dtype).itemsize

    def _invariant(shape, index_map):
        # Grid-invariant operand: single-buffer it (saves a full extra copy of
        # W1/W2 in VMEM vs. the default double buffering).
        return pl.BlockSpec(shape, index_map, pipeline_mode=pl.Buffered(1))

    x_spec = pl.BlockSpec((tile_n, d), lambda i, j: (i, 0))
    b1_spec = _invariant((1, d), lambda i, j: (0, 0))
    if num_j == 1:
        w2_spec = _invariant((d, tile_d), lambda i, j: (0, 0))
        b2_spec = _invariant((1, tile_d), lambda i, j: (0, 0))
    else:
        w2_spec = pl.BlockSpec((d, tile_d), lambda i, j: (0, j))
        b2_spec = pl.BlockSpec((1, tile_d), lambda i, j: (0, j))
    out_spec = pl.BlockSpec((tile_n, tile_d), lambda i, j: (i, j))

    if stream_w1:
        num_k = d // tile_k
        kernel = _make_w1_stream_kernel(tile_k, num_k)
        w1_spec = pl.BlockSpec(memory_space=pl.ANY)  # raw HBM; slabs DMA'd manually
        scratch_shapes = [
            pltpu.VMEM((tile_n, d), jnp.bfloat16),     # cached ReLU(fc1)
            pltpu.VMEM((tile_n, d), jnp.float32),      # fc1 f32 accumulator
            pltpu.VMEM((2, tile_k, d), jnp.bfloat16),  # W1 slab double buffer
            pltpu.SemaphoreType.DMA((2,)),
        ]
        w1_vmem = 2 * tile_k * d * 2 + tile_n * d * 4
        w1_hbm_reads = d * d * 2 * num_i               # slabs re-read per batch tile
    else:
        kernel = _fused_kernel
        w1_spec = _invariant((d, d), lambda i, j: (0, 0))
        scratch_shapes = [pltpu.VMEM((tile_n, d), jnp.bfloat16)]
        w1_vmem = d * d * 2                            # single-buffered bf16 W1
        w1_hbm_reads = d * d * 2                       # fetched once

    w2_buffers = 1 if num_j == 1 else 2
    vmem_est = (2 * tile_n * d * x_item                 # x tile (double-buffered)
                + 2 * tile_n * tile_d * out_item        # out tile (double-buffered)
                + d * 4                                  # b1 (single-buffered)
                + w2_buffers * (d * tile_d * 2 + tile_d * 4)
                + tile_n * d * 2                         # h scratch
                + w1_vmem)
    vmem_limit = int(min(vmem_cap - 8 * _MIB,
                         max(32 * _MIB, int(vmem_est * 1.25))))

    w2_hbm_reads = d * d * 2 * (num_i if num_j > 1 else 1)
    bytes_accessed = int(n_pad * d * x_item + w1_hbm_reads + w2_hbm_reads
                         + 2 * d * 4 + n_pad * d * out_item)
    flops = int(4 * n_pad * d * d)                       # two DxD matmuls

    out = pl.pallas_call(
        kernel,
        out_shape=jax.ShapeDtypeStruct((n_pad, d), out_dtype),
        grid_spec=pltpu.PrefetchScalarGridSpec(
            num_scalar_prefetch=0,
            grid=grid,
            in_specs=[x_spec, w1_spec, b1_spec, w2_spec, b2_spec],
            out_specs=out_spec,
            scratch_shapes=scratch_shapes),
        compiler_params=pltpu.CompilerParams(
            # j must stay "arbitrary": the cached ReLU(fc1) scratch carries
            # across the fc2 column steps of one batch tile.
            dimension_semantics=("parallel", "arbitrary"),
            vmem_limit_bytes=vmem_limit),
        cost_estimate=pl.CostEstimate(
            flops=flops, transcendentals=0, bytes_accessed=bytes_accessed),
    )(xp, w1, b1, w2, b2)

    return out[:n] if n_pad != n else out


def init_params(key, embed_dim):
    # Mimic nn.Linear default init: U(-1/sqrt(fan_in), 1/sqrt(fan_in)).
    k1, k2, k3, k4 = jax.random.split(key, 4)
    bound = 1.0 / jnp.sqrt(embed_dim)
    w1 = jax.random.uniform(k1, (embed_dim, embed_dim), jnp.float32, -bound, bound)
    b1 = jax.random.uniform(k2, (1, embed_dim), jnp.float32, -bound, bound)
    w2 = jax.random.uniform(k3, (embed_dim, embed_dim), jnp.float32, -bound, bound)
    b2 = jax.random.uniform(k4, (1, embed_dim), jnp.float32, -bound, bound)
    return w1, b1, w2, b2


def reference(x, w1, b1, w2, b2):
    # Same bf16-operand / f32-accumulate arithmetic as the kernel.
    h = jnp.dot(x.astype(jnp.bfloat16), w1.astype(jnp.bfloat16),
                preferred_element_type=jnp.float32)
    h = jnp.maximum(h + b1.reshape(1, -1).astype(jnp.float32), 0.0)
    h = h.astype(jnp.bfloat16)
    y = jnp.dot(h, w2.astype(jnp.bfloat16), preferred_element_type=jnp.float32)
    return y + b2.reshape(1, -1).astype(jnp.float32)


if __name__ == "__main__":
    key = jax.random.PRNGKey(0)
    k1, k2, k3, kp1, kp2 = jax.random.split(key, 5)

    # Case 1: D=128, ragged small batch (single tile; all weight specs invariant).
    d = 128
    w1, b1, w2, b2 = init_params(kp1, d)
    params = prepare_params(w1, b1, w2, b2)   # one-time bf16/f32 cast
    x = jax.random.normal(k1, (24, d), jnp.float32)
    out = jax.block_until_ready(vae_decoder(x, *params))
    assert out.shape == (24, d) and out.dtype == jnp.float32
    assert jnp.allclose(out, reference(x, w1, b1, w2, b2), atol=2e-2, rtol=2e-2)

    # Case 2: D=128, batch 300 (multiple "parallel" batch-tile steps / big tile).
    x = jax.random.normal(k2, (300, d), jnp.float32)
    out = jax.block_until_ready(vae_decoder(x, *params))
    assert out.shape == (300, d)
    assert jnp.allclose(out, reference(x, w1, b1, w2, b2), atol=2e-2, rtol=2e-2)

    # Case 3: D=256, forced W2-column streaming + manual-DMA W1 K-streaming
    # (the path used automatically for very large embed_dim).
    d = 256
    w1, b1, w2, b2 = init_params(kp2, d)
    params = prepare_params(w1, b1, w2, b2)
    x = jax.random.normal(k3, (40, d), jnp.float32)
    out = jax.block_until_ready(vae_decoder(x, *params, tile_d=128, tile_k=128))
    assert out.shape == (40, d)
    assert jnp.allclose(out, reference(x, w1, b1, w2, b2), atol=2e-2, rtol=2e-2)

    # Case 4: D=256, W2-column streaming with W1 resident (fused default path).
    out = jax.block_until_ready(vae_decoder(x, *params, tile_d=128))
    assert jnp.allclose(out, reference(x, w1, b1, w2, b2), atol=2e-2, rtol=2e-2)

    print("KERNEL_OK")
</pallas_src>

<mosaic_0001>
module attributes {stable_mosaic.version = 11 : i64} {
  func.func @_fused_kernel(%arg0: i32, %arg1: i32, %arg2: memref<32x128xf32, #tpu.memory_space<vmem>>, %arg3: memref<128x128xbf16, #tpu.memory_space<vmem>>, %arg4: memref<1x128xf32, #tpu.memory_space<vmem>>, %arg5: memref<128x128xbf16, #tpu.memory_space<vmem>>, %arg6: memref<1x128xf32, #tpu.memory_space<vmem>>, %arg7: memref<32x128xf32, #tpu.memory_space<vmem>>, %arg8: memref<32x128xbf16, #tpu.memory_space<vmem>>) attributes {dimension_semantics = [#tpu.dimension_semantics<parallel>, #tpu.dimension_semantics<arbitrary>], iteration_bounds = array<i64: 1, 1>, scalar_prefetch = 0 : i64, scratch_operands = 1 : i64, tpu.core_type = #tpu.core_type<tc>, window_params = [{transform_indices = @transform_0, window_bounds = array<i64: 32, 128>}, {pipeline_mode = #tpu.pipeline_mode<synchronous>, transform_indices = @transform_1, window_bounds = array<i64: 128, 128>}, {pipeline_mode = #tpu.pipeline_mode<synchronous>, transform_indices = @transform_2, window_bounds = array<i64: 1, 128>}, {pipeline_mode = #tpu.pipeline_mode<synchronous>, transform_indices = @transform_3, window_bounds = array<i64: 128, 128>}, {pipeline_mode = #tpu.pipeline_mode<synchronous>, transform_indices = @transform_4, window_bounds = array<i64: 1, 128>}, {transform_indices = @transform_5, window_bounds = array<i64: 32, 128>}]} {
    %c0_i32 = arith.constant 0 : i32
    %0 = arith.cmpi eq, %arg1, %c0_i32 : i32
    %1 = arith.extui %0 : i1 to i32
    %c0_i32_0 = arith.constant 0 : i32
    %2 = arith.cmpi ne, %1, %c0_i32_0 : i32
    scf.if %2 {
      %c0_8 = arith.constant 0 : index
      %c0_9 = arith.constant 0 : index
      %10 = vector.load %arg2[%c0_8, %c0_9] : memref<32x128xf32, #tpu.memory_space<vmem>>, vector<32x128xf32>
      %11 = arith.truncf %10 : vector<32x128xf32> to vector<32x128xbf16>
      %c0_10 = arith.constant 0 : index
      %c0_11 = arith.constant 0 : index
      %12 = vector.load %arg3[%c0_10, %c0_11] : memref<128x128xbf16, #tpu.memory_space<vmem>>, vector<128x128xbf16>
      %cst_12 = arith.constant dense<0.000000e+00> : vector<32x128xf32>
      %13 = tpu.matmul %11, %12, %cst_12 {dimension_numbers = #tpu.dot_dimension_numbers<[1], [0], [0], [1], [0, 0, 1, 1], [], []>} : vector<32x128xbf16>, vector<128x128xbf16>, vector<32x128xf32> -> vector<32x128xf32>
      %c0_13 = arith.constant 0 : index
      %c0_14 = arith.constant 0 : index
      %14 = vector.load %arg4[%c0_13, %c0_14] : memref<1x128xf32, #tpu.memory_space<vmem>>, vector<1x128xf32>
      %15 = vector.broadcast %14 : vector<1x128xf32> to vector<32x128xf32>
      %16 = arith.addf %13, %15 : vector<32x128xf32>
      %cst_15 = arith.constant 0.000000e+00 : f32
      %17 = vector.broadcast %cst_15 : f32 to vector<32x128xf32>
      %18 = arith.maximumf %16, %17 : vector<32x128xf32>
      %19 = arith.truncf %18 : vector<32x128xf32> to vector<32x128xbf16>
      %c0_16 = arith.constant 0 : index
      %c0_17 = arith.constant 0 : index
      %20 = vector.load %arg8[%c0_16, %c0_17] : memref<32x128xbf16, #tpu.memory_space<vmem>>, vector<32x128xbf16>
      tpu.vector_store %arg8[%c0_16, %c0_17], %19 {strides = array<i32>} : memref<32x128xbf16, #tpu.memory_space<vmem>>, vector<32x128xbf16>,
    } else {
    }
    %c0 = arith.constant 0 : index
    %c0_1 = arith.constant 0 : index
    %3 = vector.load %arg8[%c0, %c0_1] : memref<32x128xbf16, #tpu.memory_space<vmem>>, vector<32x128xbf16>
    %c0_2 = arith.constant 0 : index
    %c0_3 = arith.constant 0 : index
    %4 = vector.load %arg5[%c0_2, %c0_3] : memref<128x128xbf16, #tpu.memory_space<vmem>>, vector<128x128xbf16>
    %cst = arith.constant dense<0.000000e+00> : vector<32x128xf32>
    %5 = tpu.matmul %3, %4, %cst {dimension_numbers = #tpu.dot_dimension_numbers<[1], [0], [0], [1], [0, 0, 1, 1], [], []>} : vector<32x128xbf16>, vector<128x128xbf16>, vector<32x128xf32> -> vector<32x128xf32>
    %c0_4 = arith.constant 0 : index
    %c0_5 = arith.constant 0 : index
    %6 = vector.load %arg6[%c0_4, %c0_5] : memref<1x128xf32, #tpu.memory_space<vmem>>, vector<1x128xf32>
    %7 = vector.broadcast %6 : vector<1x128xf32> to vector<32x128xf32>
    %8 = arith.addf %5, %7 : vector<32x128xf32>
    %c0_6 = arith.constant 0 : index
    %c0_7 = arith.constant 0 : index
    %9 = vector.load %arg7[%c0_6, %c0_7] : memref<32x128xf32, #tpu.memory_space<vmem>>, vector<32x128xf32>
    tpu.vector_store %arg7[%c0_6, %c0_7], %8 {strides = array<i32>} : memref<32x128xf32, #tpu.memory_space<vmem>>, vector<32x128xf32>,
    return
  }
  func.func @transform_0(%arg0: i32, %arg1: i32) -> (i32, i32) {
    %c0_i32 = arith.constant 0 : i32
    %c0_i32_0 = arith.constant 0 : i32
    return %arg0, %c0_i32 : i32, i32
  }
  func.func @transform_1(%arg0: i32, %arg1: i32) -> (i32, i32) {
    %c0_i32 = arith.constant 0 : i32
    %c0_i32_0 = arith.constant 0 : i32
    %c0_i32_1 = arith.constant 0 : i32
    return %c0_i32, %c0_i32_0 : i32, i32
  }
  func.func @transform_2(%arg0: i32, %arg1: i32) -> (i32, i32) {
    %c0_i32 = arith.constant 0 : i32
    %c0_i32_0 = arith.constant 0 : i32
    %c0_i32_1 = arith.constant 0 : i32
    return %c0_i32, %c0_i32_0 : i32, i32
  }
  func.func @transform_3(%arg0: i32, %arg1: i32) -> (i32, i32) {
    %c0_i32 = arith.constant 0 : i32
    %c0_i32_0 = arith.constant 0 : i32
    %c0_i32_1 = arith.constant 0 : i32
    return %c0_i32, %c0_i32_0 : i32, i32
  }
  func.func @transform_4(%arg0: i32, %arg1: i32) -> (i32, i32) {
    %c0_i32 = arith.constant 0 : i32
    %c0_i32_0 = arith.constant 0 : i32
    %c0_i32_1 = arith.constant 0 : i32
    return %c0_i32, %c0_i32_0 : i32, i32
  }
  func.func @transform_5(%arg0: i32, %arg1: i32) -> (i32, i32) {
    %c0_i32 = arith.constant 0 : i32
    return %arg0, %arg1 : i32, i32
  }
}

</mosaic_0001>

<bundles_post_ra>
// kernel: tpu_custom_call.1
= control target key start
LH: loop header
LB: loop body
LE: loop exit
PB: predicated region body
PF: predicated region fallthrough
CT: control target
= control target key end

     0   :  { %10 = vsyncpa [#allocation4], 0  ;;  %s645_s0 = inlined_call_operand.hbm [shape: f32[32,128], index: 0, kind: input, shape index: {}]   ;;  %s646_s1 = inlined_call_operand.hbm [shape: bf16[128,128], index: 1, kind: input, shape index: {}]   ;;  %s647_s2 = inlined_call_operand.vmem [shape: f32[1,128], index: 2, kind: input, shape index: {}]   ;;  %s648_s3 = inlined_call_operand.hbm [shape: bf16[128,128], index: 3, kind: input, shape index: {}]   ;;  %s649_s4 = inlined_call_operand.vmem [shape: f32[1,128], index: 4, kind: input, shape index: {}]   ;;  %s650_s5 = inlined_call_operand.hbm [shape: f32[32,128], index: 5, kind: output, shape index: {}]  }
   0x1   :  { %11 = vsyncpa [#allocation7], 0 }
   0x2   :  { %12 = vsyncpa [#allocation5], 0  ;;  %s541_s18 = smov [#allocation6]   ;;  %s447_s22 = scalar_lea.hbm %s646_s1, 1024 }
   0x3   :  { %s30_s19 = sshll.u32 %s541_s18, 4  ;;  %p448_p0 = scmp.ne.s32.totalorder %s646_s1, %s447_s22  ;;  %s31_s19 = int_to_ptr.vmem [resolvable:$true] %s30_s19 }
   0x4   :  { %p451_p1 = scmp.lt.u32.totalorder %s447_s22, %s646_s1 }
   0x6   :  { %p453_p2 = pnand %p451_p1, %p448_p0 }
   0x8   :  { %456 = shalt.err (!%p453_p2)
}
   0x9   :  { %s457_s27 = scalar_lea.vmem %s31_s19, 1024  ;;  %p462_p4 = scmp.lt.s32.totalorder %s31_s19, %s31_s19 }
   0xa   :  { %p458_p3 = scmp.ne.s32.totalorder %s31_s19, %s457_s27  ;;  %p463_p5 = scmp.lt.s32.totalorder %s457_s27, %s457_s27 }
   0xc   :  { %p464_p6 = por %p463_p5, %p462_p4 }
   0xe   :  { %p465_p7 = pnand %p464_p6, %p458_p3 }
  0x10   :  { %468 = shalt.err (!%p465_p7)
}
  0x11   :  { %s542_s28 = smov 64   ;;  %s543_s29 = smov 4  }
  0x12   :  { %36 = dma.hbm_to_vmem [thread:$0]  %s646_s1, 1024, %s31_s19, [#allocation7], %s542_s28, %s542_s28, %s543_s29  }
  0x13   :  { %s544_s7 = smov [#allocation3]   ;;  %s469_s11 = scalar_lea.hbm %s645_s0, 512 }
  0x14   :  { %s18_s8 = sshll.u32 %s544_s7, 4  ;;  %p470_p8 = scmp.ne.s32.totalorder %s645_s0, %s469_s11  ;;  %s19_s8 = int_to_ptr.vmem [resolvable:$true] %s18_s8 }
  0x15   :  { %p473_p9 = scmp.lt.u32.totalorder %s469_s11, %s645_s0 }
  0x17   :  { %p475_p10 = pnand %p473_p9, %p470_p8 }
  0x19   :  { %478 = shalt.err (!%p475_p10)
}
  0x1a   :  { %s479_s16 = scalar_lea.vmem %s19_s8, 512  ;;  %p484_p12 = scmp.lt.s32.totalorder %s19_s8, %s19_s8 }
  0x1b   :  { %p480_p11 = scmp.ne.s32.totalorder %s19_s8, %s479_s16  ;;  %p485_p13 = scmp.lt.s32.totalorder %s479_s16, %s479_s16 }
  0x1d   :  { %p486_p0 = por %p485_p13, %p484_p12 }
  0x1f   :  { %p487_p1 = pnand %p486_p0, %p480_p11 }
  0x21   :  { %490 = shalt.err (!%p487_p1)
}
  0x22   :  { %s545_s1 = smov 128   ;;  %s546_s17 = smov 8  }
  0x23   :  { %24 = dma.hbm_to_vmem [thread:$0]  %s645_s0, 512, %s19_s8, [#allocation4], %s545_s1, %s545_s1, %s546_s17  }
  0x24   :  { %s547_s20 = smov [#allocation8]   ;;  %s491_s24 = scalar_lea.hbm %s648_s3, 1024 }
  0x25   :  { %s44_s21 = sshll.u32 %s547_s20, 4  ;;  %p492_p2 = scmp.ne.s32.totalorder %s648_s3, %s491_s24  ;;  %s45_s21 = int_to_ptr.vmem [resolvable:$true] %s44_s21 }
  0x26   :  { %p495_p3 = scmp.lt.u32.totalorder %s491_s24, %s648_s3 }
  0x28   :  { %p497_p4 = pnand %p495_p3, %p492_p2 }
  0x2a   :  { %500 = shalt.err (!%p497_p4)
}
  0x2b   :  { %s501_s6 = scalar_lea.vmem %s45_s21, 1024  ;;  %p506_p6 = scmp.lt.s32.totalorder %s45_s21, %s45_s21 }
  0x2c   :  { %p502_p5 = scmp.ne.s32.totalorder %s45_s21, %s501_s6  ;;  %p507_p7 = scmp.lt.s32.totalorder %s501_s6, %s501_s6 }
  0x2e   :  { %p508_p8 = por %p507_p7, %p506_p6 }
  0x30   :  { %p509_p9 = pnand %p508_p8, %p502_p5 }
  0x32   :  { %512 = shalt.err (!%p509_p9)
}
  0x33   :  { %50 = dma.hbm_to_vmem [thread:$0]  %s648_s3, 1024, %s45_s21, [#allocation7], %s542_s28, %s542_s28, %s543_s29  }
  0x34   :  { %535 = dma.done.wait [#allocation4], 512  }
  0x35   :  { %536 = vsyncadd [#allocation4], 4294966784 }
  0x36   :  { %537 = dma.done.wait [#allocation7], 2048  }
  0x37   :  { %538 = vsyncadd [#allocation7], 4294965248  ;;  %v431_v0 = vld [vmem:[#allocation6] sm:$0xff]   ;;  %v432_v1 = vld [vmem:[#allocation6 + $0x8] sm:$0xff]  }
  0x38   :  { %383 = vmatprep.subr.bf16.mxu0 %v431_v0  ;;  %v433_v2 = vld [vmem:[#allocation6 + $0x10] sm:$0xff]   ;;  %v434_v3 = vld [vmem:[#allocation6 + $0x18] sm:$0xff]   ;;  %v67_v4 = vld [vmem:[#allocation3] sm:$0xff] }
  0x39   :  { %384 = vmatpush3.bf16.msra.mxu0 %v431_v0  ;;  %v68_v5 = vld [vmem:[#allocation3 + $0x8] sm:$0xff]  ;;  %v439_v7 = vld [vmem:[#allocation8] sm:$0xff]   ;;  %v441_v10 = vld [vmem:[#allocation8 + $0x10] sm:$0xff]  }
  0x3a   :  { %385 = vmatprep.subr.bf16.mxu0 %v432_v1  ;;  %v71_v6 = vpack.c.bf16 %v68_v5, %v67_v4  ;;  %v440_v8 = vld [vmem:[#allocation8 + $0x8] sm:$0xff]   ;;  %v435_v9 = vld [vmem:[#allocation6 + $0x20] sm:$0xff]   ;;  %403 = vmatprep.subr.bf16.mxu1 %v439_v7  ;;  %v442_v12 = vld [vmem:[#allocation8 + $0x18] sm:$0xff]  }
  0x3b   :  { %404 = vmatpush3.bf16.msra.mxu1 %v439_v7  ;;  %v436_v11 = vld [vmem:[#allocation6 + $0x28] sm:$0xff]   ;;  %v437_v13 = vld [vmem:[#allocation6 + $0x30] sm:$0xff]   ;;  %v443_v14 = vld [vmem:[#allocation8 + $0x20] sm:$0xff]  }
  0x3c   :  { %399 = vmatprep.mubr.bf16.mxu0 %v71_v6  ;;  %405 = vmatprep.subr.bf16.mxu1 %v440_v8  ;;  %v438_v15 = vld [vmem:[#allocation6 + $0x38] sm:$0xff]   ;;  %v444_v16 = vld [vmem:[#allocation8 + $0x28] sm:$0xff]   ;;  %v69_v17 = vld [vmem:[#allocation3 + $0x10] sm:$0xff] }
  0x3d   :  { %386 = vmatpush3.bf16.msra.mxu0 %v432_v1  ;;  %v70_v18 = vld [vmem:[#allocation3 + $0x18] sm:$0xff]  ;;  %v445_v20 = vld [vmem:[#allocation8 + $0x30] sm:$0xff]   ;;  %v345_v22 = vld [vmem:[%s647_s2] ss:$0 sm:$0xff]  ;;  %s548_s2 = smov [#allocation9]  }
  0x3e   :  { %387 = vmatprep.subr.bf16.mxu0 %v433_v2  ;;  %v72_v19 = vpack.c.bf16 %v70_v18, %v69_v17  ;;  %v446_v21 = vld [vmem:[#allocation8 + $0x38] sm:$0xff]   ;;  %v354_v37 = vld [vmem:[%s649_s4] ss:$0 sm:$0xff]  ;;  %s332_s9 = sshll.u32 %s548_s2, 4  ;;  %s333_s9 = int_to_ptr.vmem [resolvable:$true] %s332_s9 }
  0x3f   :  { %406 = vmatpush3.bf16.msra.mxu1 %v440_v8  ;;  %s513_s10 = scalar_lea.vmem %s333_s9, 512  ;;  %p518_p11 = scmp.lt.s32.totalorder %s333_s9, %s333_s9 }
  0x40   :  { %407 = vmatprep.subr.bf16.mxu1 %v441_v10  ;;  %p514_p10 = scmp.ne.s32.totalorder %s333_s9, %s513_s10  ;;  %p519_p12 = scmp.lt.s32.totalorder %s513_s10, %s513_s10 }
  0x41   :  { %388 = vmatpush3.bf16.msra.mxu0 %v433_v2 }
  0x42   :  { %389 = vmatprep.subr.bf16.mxu0 %v434_v3  ;;  %p520_p13 = por %p519_p12, %p518_p11 }
  0x43   :  { %408 = vmatpush3.bf16.msra.mxu1 %v441_v10 }
  0x44   :  { %409 = vmatprep.subr.bf16.mxu1 %v442_v12  ;;  %p521_p0 = pnand %p520_p13, %p514_p10 }
  0x45   :  { %390 = vmatpush3.bf16.msra.mxu0 %v434_v3 }
  0x46   :  { %391 = vmatprep.subr.bf16.mxu0 %v435_v9 }
  0x47   :  { %410 = vmatpush3.bf16.msra.mxu1 %v442_v12 }
  0x48   :  { %411 = vmatprep.subr.bf16.mxu1 %v443_v14 }
  0x49   :  { %392 = vmatpush3.bf16.msra.mxu0 %v435_v9 }
  0x4a   :  { %393 = vmatprep.subr.bf16.mxu0 %v436_v11 }
  0x4b   :  { %412 = vmatpush3.bf16.msra.mxu1 %v443_v14 }
  0x4c   :  { %413 = vmatprep.subr.bf16.mxu1 %v444_v16 }
  0x4d   :  { %394 = vmatpush3.bf16.msra.mxu0 %v436_v11 }
  0x4e   :  { %395 = vmatprep.subr.bf16.mxu0 %v437_v13 }
  0x4f   :  { %414 = vmatpush3.bf16.msra.mxu1 %v444_v16 }
  0x50   :  { %415 = vmatprep.subr.bf16.mxu1 %v445_v20 }
  0x51   :  { %396 = vmatpush3.bf16.msra.mxu0 %v437_v13 }
  0x52   :  { %397 = vmatprep.subr.bf16.mxu0 %v438_v15 }
  0x53   :  { %416 = vmatpush3.bf16.msra.mxu1 %v445_v20 }
  0x54   :  { %417 = vmatprep.subr.bf16.mxu1 %v446_v21 }
  0x55   :  { %398 = vmatpush3.bf16.msra.mxu0 %v438_v15 }
  0x57   :  { %418 = vmatpush3.bf16.msra.mxu1 %v446_v21 }
  0x58   :  { %400 = vmatmul.mubr.bf16.vlgmr.msra.gmra.mrb[0].mxu0 %v72_v19 }
 0x12b   :  { %v401_v23 = vpop.f32.mrb[0].mxu0 }
 0x12c   :  { %v187_v24 = vadd.f32 %v401_v23, %v345_v22  ;;  %v178_v25 = vpop.f32.mrb[1].mxu0 }
 0x12d   :  { %v179_v26 = vadd.f32 %v345_v22, %v178_v25  ;;  %v402_v27 = vpop.f32.mrb[2].mxu0 }
 0x12e   :  { %v190_v28 = vadd.f32 %v402_v27, %v345_v22  ;;  %v181_v29 = vpop.f32.mrb[3].mxu0  ;;  %v195_v31 = vmax.f32 %v187_v24, 0.0 }
 0x12f   :  { %v182_v30 = vadd.f32 %v345_v22, %v181_v29  ;;  %v193_v33 = vmax.f32 %v179_v26, 0.0 }
 0x130   :  { %v196_v32 = vmax.f32 %v190_v28, 0.0 }
 0x131   :  { %v194_v34 = vmax.f32 %v182_v30, 0.0 }
 0x132   :  { %v198_v35 = vpack.c.bf16 %v196_v32, %v195_v31 }
 0x133   :  { %v197_v36 = vpack.c.bf16 %v194_v34, %v193_v33 }
 0x135   :  { %419 = vmatprep.mubr.bf16.mxu1 %v197_v36 }
 0x136   :  { %420 = vmatmul.mubr.bf16.vlgmr.msra.gmra.mrb[0].mxu1 %v198_v35 }
 0x209   :  { %v421_v38 = vpop.f32.mrb[0].mxu1 }
 0x20a   :  { %v317_v39 = vadd.f32 %v421_v38, %v354_v37  ;;  %v308_v40 = vpop.f32.mrb[1].mxu1 }
 0x20b   :  { %v309_v41 = vadd.f32 %v354_v37, %v308_v40  ;;  %v422_v42 = vpop.f32.mrb[2].mxu1 }
 0x20c   :  { %325 = vst [vmem:[#allocation9 + $0x10] sm:$0xff] %v317_v39  ;;  %v320_v43 = vadd.f32 %v422_v42, %v354_v37  ;;  %v311_v44 = vpop.f32.mrb[3].mxu1 }
 0x20d   :  { %323 = vst [vmem:[#allocation9] sm:$0xff] %v309_v41  ;;  %v312_v45 = vadd.f32 %v354_v37, %v311_v44 }
 0x20e   :  { %326 = vst [vmem:[#allocation9 + $0x18] sm:$0xff] %v320_v43 }
 0x20f   :  { %324 = vst [vmem:[#allocation9 + $0x8] sm:$0xff] %v312_v45 }
 0x210   :  { %524 = shalt.err (!%p521_p0)
}
 0x211   :  { %s525_s12 = scalar_lea.hbm %s650_s5, 512 }
 0x212   :  { %p526_p1 = scmp.ne.s32.totalorder %s650_s5, %s525_s12  ;;  %p529_p2 = scmp.lt.u32.totalorder %s525_s12, %s650_s5 }
 0x214   :  { %p531_p3 = pnand %p529_p2, %p526_p1 }
 0x216   :  { %534 = shalt.err (!%p531_p3)
}
 0x217   :  { %338 = dma.vmem_to_hbm [thread:$0]  %s333_s9, 512, %s650_s5, [#allocation5], %s545_s1, %s545_s1, %s546_s17  }
 0x218   :  { %539 = dma.done.wait [#allocation5], 512  }
 0x219   :  { %540 = vsyncadd [#allocation5], 4294966784 }
 0x21a   :  { %342 = vsyncpa [#allocation4], 1 }
 0x21b   :  { %343 = vsyncpa [#allocation7], 1 }
 0x21c   :  { %344 = vsyncpa [#allocation5], 1 }

</bundles_post_ra>
